<compile_context>
chip_gen: v7x
topology: tpu7x:2x2x1
jax: 0.10.0
libtpu: 0.0.40
codegen_flags: <defaults>
</compile_context>

<pallas_src>
import jax
import jax.numpy as jnp
from jax import lax
from jax.experimental import pallas as pl
from jax.experimental.pallas import tpu as pltpu


def _round_up(v, m):
    return ((v + m - 1) // m) * m


def _sh_kernel(a_ref, f_ref, w1a_ref, w1f_ref, w2_ref, o_ref):
    # bf16 MXU inputs, f32 accumulation.  Split first matmul: a @ W1_top + f @ W1_bot
    # == concat((a, f), -1) @ W1 without ever materializing the concat.
    wdt = w1a_ref.dtype
    h = jnp.dot(a_ref[...].astype(wdt), w1a_ref[...],
                preferred_element_type=jnp.float32)
    h = h + jnp.dot(f_ref[...].astype(wdt), w1f_ref[...],
                    preferred_element_type=jnp.float32)
    h = jnp.maximum(h, 0.0)                                   # ReLU in f32 (VPU)
    out = jnp.dot(h.astype(w2_ref.dtype), w2_ref[...],
                  preferred_element_type=jnp.float32)
    # L2 "normalize" exactly as the module: out / sqrt(sum(out^2, -1)).
    # (No epsilon in the original; an all-zero row would NaN there too.  Garbage rows
    # from the ragged last block stay row-local and are clipped on writeback.)
    ss = jnp.sum(out * out, axis=-1, keepdims=True)
    o_ref[...] = (out * lax.rsqrt(ss)).astype(o_ref.dtype)    # rsqrt -> EUP slot


def sh_decoder_pallas(a, f, w1, w2, *, tile_m=8192, mxu_dtype=jnp.bfloat16,
                      out_dtype=None):
    """a: (N, a_dim) = x or d;  f: (N, f_dim);  w1: (a_dim+f_dim, H);  w2: (H, out_dim)."""
    n, a_dim = a.shape
    f_dim = f.shape[1]
    hidden = w1.shape[1]
    out_dim = w2.shape[1]
    assert w1.shape[0] == a_dim + f_dim, "W1 rows must equal a_dim + f_dim"
    out_dtype = a.dtype if out_dtype is None else out_dtype

    # Tile sizing: multiple of 8 (sublane axis) and no larger than the 8-rounded batch.
    tile_m = max(8, min(_round_up(tile_m, 8), _round_up(n, 8)))
    # Megacore (v7x) load balance: keep >= ~8 grid steps when that still leaves at
    # least 2048 rows per tile (per-step DMA >= ~0.25 MiB so the ~0.35 us fixed
    # per-grid-step overhead stays amortized).  Single-TC v5e/v6e are unaffected.
    balanced = _round_up(pl.cdiv(n, 8), 8)
    if balanced >= 2048:
        tile_m = min(tile_m, balanced)

    grid = (pl.cdiv(n, tile_m),)   # ragged last block handled by Pallas clipping

    # Split W1 so the concat never exists in HBM; store weights in bf16 (tiny).
    w1a = w1[:a_dim].astype(mxu_dtype)
    w1f = w1[a_dim:].astype(mxu_dtype)
    w2c = w2.astype(mxu_dtype)

    # ~5 KiB of lane-padded, double-buffered VMEM per tile row (+ headroom), capped
    # below v7x's 64 MiB physical VMEM.  Explicit so v5e's 16 MiB / v6e's 32 MiB
    # scoped defaults don't bound the tile size.
    vmem_bytes = int(min(6 * 1024 * tile_m + (8 << 20), 60 << 20))

    return pl.pallas_call(
        _sh_kernel,
        out_shape=jax.ShapeDtypeStruct((n, out_dim), out_dtype),
        grid_spec=pltpu.PrefetchScalarGridSpec(
            num_scalar_prefetch=0,
            grid=grid,
            in_specs=[
                pl.BlockSpec((tile_m, a_dim), lambda i: (i, 0)),
                pl.BlockSpec((tile_m, f_dim), lambda i: (i, 0)),
                pl.BlockSpec((a_dim, hidden), lambda i: (0, 0)),
                pl.BlockSpec((f_dim, hidden), lambda i: (0, 0)),
                pl.BlockSpec((hidden, out_dim), lambda i: (0, 0)),
            ],
            out_specs=pl.BlockSpec((tile_m, out_dim), lambda i: (i, 0)),
        ),
        compiler_params=pltpu.CompilerParams(
            dimension_semantics=("parallel",),
            vmem_limit_bytes=vmem_bytes),
    )(a, f, w1a, w1f, w2c)


def sh_forward(x, d, f, w1, w2, **kw):
    """Mirror of SH.forward: uses x if given, else d, concatenated (in-kernel) with f."""
    a = x if x is not None else d
    return sh_decoder_pallas(a, f, w1, w2, **kw)


def sh_forward_ref(x, d, f, w1, w2, mxu_dtype=jnp.bfloat16):
    """Pure-JAX reference mirroring the kernel's numerics (bf16 MXU inputs, f32 accum)."""
    a = x if x is not None else d
    feat = jnp.concatenate((a, f), axis=-1)
    h = jnp.dot(feat.astype(mxu_dtype), w1.astype(mxu_dtype),
                preferred_element_type=jnp.float32)
    h = jnp.maximum(h, 0.0)
    out = jnp.dot(h.astype(mxu_dtype), w2.astype(mxu_dtype),
                  preferred_element_type=jnp.float32)
    ss = jnp.sum(out ** 2, axis=-1, keepdims=True)
    return out / jnp.sqrt(ss)


if __name__ == "__main__":
    key = jax.random.PRNGKey(0)
    k_x, k_d, k_f, k_w1, k_w2 = jax.random.split(key, 5)

    # Small shapes consistent with the module; N deliberately not a multiple of 8 to
    # exercise the ragged-last-block (clipped writeback) path.
    N = 37
    x_dim = 4            # positional feature dim
    f_dim = 12           # latent feature dim
    in_dim = x_dim + f_dim   # 16 = decoder input dim
    hidden = 32
    out_dim = 16         # SH coefficients

    x = jax.random.normal(k_x, (N, x_dim), dtype=jnp.float32)
    d = jax.random.normal(k_d, (N, 3), dtype=jnp.float32)    # unused branch (x is not None)
    f = jax.random.normal(k_f, (N, f_dim), dtype=jnp.float32)

    # Deterministic weights (tcnn CutlassMLP has no biases).
    w1 = jax.random.normal(k_w1, (in_dim, hidden), dtype=jnp.float32) * (1.0 / jnp.sqrt(in_dim))
    w2 = jax.random.normal(k_w2, (hidden, out_dim), dtype=jnp.float32) * (1.0 / jnp.sqrt(hidden))

    out = sh_forward(x, d, f, w1, w2)
    out = jax.block_until_ready(out)

    ref = sh_forward_ref(x, d, f, w1, w2)
    assert out.shape == (N, out_dim)
    max_err = float(jnp.max(jnp.abs(out - ref)))
    # Kernel splits the K=16 layer-1 accumulation into K=4 + K=12 partial sums, so a rare
    # bf16 rounding-boundary flip vs. the concat reference is possible -> 5e-3 tolerance.
    assert jnp.allclose(out, ref, atol=5e-3, rtol=5e-3), max_err
    # Row norms should be (numerically) 1.
    assert jnp.allclose(jnp.linalg.norm(out, axis=-1), 1.0, atol=1e-3)

    print("KERNEL_OK")
</pallas_src>

<mosaic_0001>
module attributes {stable_mosaic.version = 11 : i64} {
  func.func @_sh_kernel(%arg0: i32, %arg1: memref<40x4xf32, #tpu.memory_space<vmem>>, %arg2: memref<40x12xf32, #tpu.memory_space<vmem>>, %arg3: memref<4x32xbf16, #tpu.memory_space<vmem>>, %arg4: memref<12x32xbf16, #tpu.memory_space<vmem>>, %arg5: memref<32x16xbf16, #tpu.memory_space<vmem>>, %arg6: memref<40x16xf32, #tpu.memory_space<vmem>>) attributes {dimension_semantics = [#tpu.dimension_semantics<parallel>], iteration_bounds = array<i64: 1>, scalar_prefetch = 0 : i64, scratch_operands = 0 : i64, tpu.core_type = #tpu.core_type<tc>, window_params = [{transform_indices = @transform_0, window_bounds = array<i64: 40, 4>}, {transform_indices = @transform_1, window_bounds = array<i64: 40, 12>}, {pipeline_mode = #tpu.pipeline_mode<synchronous>, transform_indices = @transform_2, window_bounds = array<i64: 4, 32>}, {pipeline_mode = #tpu.pipeline_mode<synchronous>, transform_indices = @transform_3, window_bounds = array<i64: 12, 32>}, {pipeline_mode = #tpu.pipeline_mode<synchronous>, transform_indices = @transform_4, window_bounds = array<i64: 32, 16>}, {transform_indices = @transform_5, window_bounds = array<i64: 40, 16>}]} {
    %c0 = arith.constant 0 : index
    %c0_0 = arith.constant 0 : index
    %0 = vector.load %arg1[%c0, %c0_0] : memref<40x4xf32, #tpu.memory_space<vmem>>, vector<40x4xf32>
    %1 = arith.truncf %0 : vector<40x4xf32> to vector<40x4xbf16>
    %c0_1 = arith.constant 0 : index
    %c0_2 = arith.constant 0 : index
    %2 = vector.load %arg3[%c0_1, %c0_2] : memref<4x32xbf16, #tpu.memory_space<vmem>>, vector<4x32xbf16>
    %cst = arith.constant dense<0.000000e+00> : vector<40x32xf32>
    %3 = tpu.matmul %1, %2, %cst {dimension_numbers = #tpu.dot_dimension_numbers<[1], [0], [0], [1], [0, 0, 1, 1], [], []>} : vector<40x4xbf16>, vector<4x32xbf16>, vector<40x32xf32> -> vector<40x32xf32>
    %c0_3 = arith.constant 0 : index
    %c0_4 = arith.constant 0 : index
    %4 = vector.load %arg2[%c0_3, %c0_4] : memref<40x12xf32, #tpu.memory_space<vmem>>, vector<40x12xf32>
    %5 = arith.truncf %4 : vector<40x12xf32> to vector<40x12xbf16>
    %c0_5 = arith.constant 0 : index
    %c0_6 = arith.constant 0 : index
    %6 = vector.load %arg4[%c0_5, %c0_6] : memref<12x32xbf16, #tpu.memory_space<vmem>>, vector<12x32xbf16>
    %cst_7 = arith.constant dense<0.000000e+00> : vector<40x32xf32>
    %7 = tpu.matmul %5, %6, %cst_7 {dimension_numbers = #tpu.dot_dimension_numbers<[1], [0], [0], [1], [0, 0, 1, 1], [], []>} : vector<40x12xbf16>, vector<12x32xbf16>, vector<40x32xf32> -> vector<40x32xf32>
    %8 = arith.addf %3, %7 : vector<40x32xf32>
    %cst_8 = arith.constant 0.000000e+00 : f32
    %9 = vector.broadcast %cst_8 : f32 to vector<40x32xf32>
    %10 = arith.maximumf %8, %9 : vector<40x32xf32>
    %11 = arith.truncf %10 : vector<40x32xf32> to vector<40x32xbf16>
    %c0_9 = arith.constant 0 : index
    %c0_10 = arith.constant 0 : index
    %12 = vector.load %arg5[%c0_9, %c0_10] : memref<32x16xbf16, #tpu.memory_space<vmem>>, vector<32x16xbf16>
    %cst_11 = arith.constant dense<0.000000e+00> : vector<40x16xf32>
    %13 = tpu.matmul %11, %12, %cst_11 {dimension_numbers = #tpu.dot_dimension_numbers<[1], [0], [0], [1], [0, 0, 1, 1], [], []>} : vector<40x32xbf16>, vector<32x16xbf16>, vector<40x16xf32> -> vector<40x16xf32>
    %14 = arith.mulf %13, %13 : vector<40x16xf32>
    %cst_12 = arith.constant dense<0.000000e+00> : vector<40xf32>
    %15 = vector.multi_reduction <add>, %14, %cst_12 [1] : vector<40x16xf32> to vector<40xf32>
    %16 = vector.shape_cast %15 : vector<40xf32> to vector<40x1xf32>
    %17 = math.rsqrt %16 : vector<40x1xf32>
    %18 = vector.broadcast %17 : vector<40x1xf32> to vector<40x16xf32>
    %19 = arith.mulf %13, %18 : vector<40x16xf32>
    %c0_13 = arith.constant 0 : index
    %c0_14 = arith.constant 0 : index
    %20 = vector.load %arg6[%c0_13, %c0_14] : memref<40x16xf32, #tpu.memory_space<vmem>>, vector<40x16xf32>
    tpu.vector_store %arg6[%c0_13, %c0_14], %19 {strides = array<i32>} : memref<40x16xf32, #tpu.memory_space<vmem>>, vector<40x16xf32>,
    return
  }
  func.func @transform_0(%arg0: i32) -> (i32, i32) {
    %c0_i32 = arith.constant 0 : i32
    %c0_i32_0 = arith.constant 0 : i32
    return %arg0, %c0_i32 : i32, i32
  }
  func.func @transform_1(%arg0: i32) -> (i32, i32) {
    %c0_i32 = arith.constant 0 : i32
    %c0_i32_0 = arith.constant 0 : i32
    return %arg0, %c0_i32 : i32, i32
  }
  func.func @transform_2(%arg0: i32) -> (i32, i32) {
    %c0_i32 = arith.constant 0 : i32
    %c0_i32_0 = arith.constant 0 : i32
    %c0_i32_1 = arith.constant 0 : i32
    return %c0_i32, %c0_i32_0 : i32, i32
  }
  func.func @transform_3(%arg0: i32) -> (i32, i32) {
    %c0_i32 = arith.constant 0 : i32
    %c0_i32_0 = arith.constant 0 : i32
    %c0_i32_1 = arith.constant 0 : i32
    return %c0_i32, %c0_i32_0 : i32, i32
  }
  func.func @transform_4(%arg0: i32) -> (i32, i32) {
    %c0_i32 = arith.constant 0 : i32
    %c0_i32_0 = arith.constant 0 : i32
    %c0_i32_1 = arith.constant 0 : i32
    return %c0_i32, %c0_i32_0 : i32, i32
  }
  func.func @transform_5(%arg0: i32) -> (i32, i32) {
    %c0_i32 = arith.constant 0 : i32
    %c0_i32_0 = arith.constant 0 : i32
    return %arg0, %c0_i32 : i32, i32
  }
}

</mosaic_0001>

<bundles_post_ra>
// kernel: tpu_custom_call.1
= control target key start
LH: loop header
LB: loop body
LE: loop exit
PB: predicated region body
PF: predicated region fallthrough
CT: control target
= control target key end

     0   :  { %vm55_vm0 = vcmask 1045504   ;;  %v408_v0 = vmov 0.0   ;;  %vm409_vm1 = vmmov 0   ;;  %vm125_vm2 = vcmask 1041408   ;;  %s536_s3 = inlined_call_operand.vmem [shape: bf16[12,32], index: 3, kind: input, shape index: {}]   ;;  %s537_s1 = inlined_call_operand.vmem [shape: f32[37,12], index: 1, kind: input, shape index: {}]   ;;  %s538_s2 = inlined_call_operand.vmem [shape: bf16[4,32], index: 2, kind: input, shape index: {}]   ;;  %s539_s4 = inlined_call_operand.vmem [shape: bf16[32,16], index: 4, kind: input, shape index: {}]   ;;  %s540_s0 = inlined_call_operand.vmem [shape: f32[37,4], index: 0, kind: input, shape index: {}]   ;;  %s541_s5 = inlined_call_operand.vmem [shape: f32[37,16], index: 5, kind: output, shape index: {}]  }
   0x1   :  { %340 = vmatprep.subr.bf16.mxu0 %v408_v0  ;;  %v395_v1 = vld [vmem:[%s536_s3] sm:$0x3f]   ;;  %342 = vmatprep.mubr.msk.bf16.mxu0 %vm409_vm1, %v408_v0  ;;  %v31_v3 = vld [vmem:[%s537_s1 + $0x8] sm:$0xff]  ;;  %v32_v7 = vld [vmem:[%s537_s1 + $0x10] sm:$0xff]  ;;  %vm45_vm3 = vcmask 97280   ;;  %vm115_vm4 = vcmask 31744  }
   0x2   :  { %v30_v2 = vld [vmem:[%s537_s1] sm:$0xff]  ;;  %384 = vmatprep.subr.bf16.mxu1 %v408_v0  ;;  %346 = vmatprep.mubr.msk.bf16.mxu1 %vm409_vm1, %v408_v0  ;;  %v57_v5 = vsel %vm55_vm0, %v395_v1, 0  ;;  %v33_v8 = vld [vmem:[%s537_s1 + $0x18] sm:$0xff]  ;;  %v22_v15 = vld [vmem:[%s540_s0 + $0x8] sm:$0xff]  ;;  %vm209_vm5 = vcmask 261120   ;;  %vm280_vm6 = vcmask 130048  }
   0x3   :  { %v29_v4 = vld [vmem:[%s538_s2] sm:$0x3]  ;;  %v35_v6 = vpack.c.bf16 %v31_v3, %v30_v2  ;;  %341 = vmatpush3.bf16.msra.mxu0 %v57_v5  ;;  %385 = vmatpush3.bf16.msra.mxu1 %v57_v5  ;;  %v36_v10 = vpack.c.bf16 %v33_v8, %v32_v7  ;;  %v23_v17 = vld [vmem:[%s540_s0 + $0x10] sm:$0xff]  ;;  %v24_v18 = vld [vmem:[%s540_s0 + $0x18] sm:$0xff] }
   0x4   :  { %354 = vmatprep.subr.bf16.mxu0 %v408_v0  ;;  %v127_v9 = vsel %vm125_vm2, %v29_v4, 0  ;;  %368 = vmatprep.subr.bf16.mxu1 %v408_v0  ;;  %v396_v11 = vld [vmem:[%s539_s4] sm:$0xff]   ;;  %v27_v19 = vpack.c.bf16 %v24_v18, %v23_v17  ;;  %v397_v22 = vld [vmem:[%s539_s4 + $0x8] sm:$0xff]  }
   0x5   :  { %v34_v12 = vld [vmem:[%s537_s1 + $0x20] sm:$0xff] }
   0x6   :  { %343 = vmatmul.mubr.msk.bf16.vlgmr.msra.gmra.mrb[0].mxu0 %vm45_vm3, %v35_v6  ;;  %347 = vmatmul.mubr.msk.bf16.vlgmr.msra.gmra.mrb[0].mxu1 %vm45_vm3, %v36_v10  ;;  %v37_v13 = vpack.c.bf16 %v34_v12, %v34_v12  ;;  %v21_v14 = vld [vmem:[%s540_s0] sm:$0xff] }
   0x7   :  { %355 = vmatpush3.bf16.msra.mxu0 %v127_v9  ;;  %356 = vmatprep.mubr.msk.bf16.mxu0 %vm409_vm1, %v408_v0  ;;  %v26_v16 = vpack.c.bf16 %v22_v15, %v21_v14  ;;  %v25_v20 = vld [vmem:[%s540_s0 + $0x20] sm:$0xff] }
   0x8   :  { %350 = vmatprep.mubr.msk.bf16.mxu1 %vm409_vm1, %v408_v0  ;;  %369 = vmatpush3.bf16.msra.mxu1 %v396_v11  ;;  %v28_v21 = vpack.c.bf16 %v25_v20, %v25_v20 }
   0x9   :  { %370 = vmatprep.subr.bf16.mxu1 %v408_v0 }
   0xc   :  { %371 = vmatpush3.bf16.msra.mxu1 %v397_v22 }
   0xe   :  { %351 = vmatmul.mubr.msk.bf16.gmra.mrb[4].mxu1 %vm45_vm3, %v37_v13 }
   0xf   :  { %372 = vmatprep.mubr.msk.bf16.mxu1 %vm409_vm1, %v408_v0 }
  0x12   :  { %357 = vmatmul.mubr.msk.bf16.vlgmr.msra.gmra.mrb[0].mxu0 %vm115_vm4, %v26_v16 }
  0x13   :  { %360 = vmatprep.mubr.msk.bf16.mxu0 %vm409_vm1, %v408_v0 }
  0x1a   :  { %361 = vmatmul.mubr.msk.bf16.gmra.mrb[4].mxu0 %vm115_vm4, %v27_v19 }
  0x1b   :  { %364 = vmatprep.mubr.msk.bf16.mxu0 %vm409_vm1, %v408_v0 }
  0x22   :  { %365 = vmatmul.mubr.msk.bf16.gmra.mrb[8].mxu0 %vm115_vm4, %v28_v21 }
  0xd9   :  { %v101_v23 = vpop.f32.mrb[0].mxu1 }
  0xda   :  { %v348_v24 = vpop.f32.mrb[1].mxu1 }
  0xdb   :  { %v104_v25 = vpop.f32.mrb[2].mxu1 }
  0xdc   :  { %v349_v26 = vpop.f32.mrb[3].mxu1 }
  0xe1   :  { %v109_v27 = vpop.f32.mrb[4].mxu1 }
  0xe2   :  { %v352_v28 = vpop.f32.mrb[5].mxu1 }
  0xe3   :  { %v112_v29 = vpop.f32.mrb[6].mxu1 }
  0xe4   :  { %v353_v30 = vpop.f32.mrb[7].mxu1 }
  0xe5   :  { %v163_v31 = vpop.f32.mrb[0].mxu0 }
  0xe6   :  { %v358_v32 = vpop.f32.mrb[1].mxu0  ;;  %v185_v34 = vmax.f32 %v163_v31, 0.0 }
  0xe7   :  { %v166_v33 = vpop.f32.mrb[2].mxu0 }
  0xe8   :  { %v186_v35 = vmax.f32 %v166_v33, 0.0  ;;  %v359_v36 = vpop.f32.mrb[3].mxu0 }
  0xea   :  { %v190_v37 = vpack.c.bf16 %v186_v35, %v185_v34 }
  0xec   :  { %373 = vmatmul.mubr.msk.bf16.vlgmr.msra.gmra.mrb[8].mxu1 %vm209_vm5, %v190_v37 }
  0xed   :  { %v171_v38 = vpop.f32.mrb[4].mxu0  ;;  %376 = vmatprep.mubr.msk.bf16.mxu1 %vm409_vm1, %v408_v0 }
  0xee   :  { %v172_v39 = vadd.f32 %v171_v38, %v101_v23  ;;  %v362_v40 = vpop.f32.mrb[5].mxu0 }
  0xef   :  { %v174_v41 = vpop.f32.mrb[6].mxu0 }
  0xf0   :  { %v175_v42 = vadd.f32 %v174_v41, %v104_v25  ;;  %v363_v43 = vpop.f32.mrb[7].mxu0  ;;  %v187_v44 = vmax.f32 %v172_v39, 0.0 }
  0xf2   :  { %v188_v45 = vmax.f32 %v175_v42, 0.0 }
  0xf4   :  { %v191_v46 = vpack.c.bf16 %v188_v45, %v187_v44 }
  0xf5   :  { %v179_v47 = vpop.f32.mrb[8].mxu0 }
  0xf6   :  { %v180_v48 = vadd.f32 %v179_v47, %v109_v27  ;;  %v366_v49 = vpop.f32.mrb[9].mxu0  ;;  %377 = vmatmul.mubr.msk.bf16.gmra.mrb[12].mxu1 %vm209_vm5, %v191_v46 }
  0xf7   :  { %v182_v50 = vpop.f32.mrb[10].mxu0  ;;  %380 = vmatprep.mubr.msk.bf16.mxu1 %vm409_vm1, %v408_v0 }
  0xf8   :  { %v189_v51 = vmax.f32 %v180_v48, 0.0  ;;  %v367_v52 = vpop.f32.mrb[11].mxu0 }
  0xfa   :  { %v192_v53 = vpack.c.bf16 %v189_v51, %v189_v51 }
  0xfe   :  { %381 = vmatmul.mubr.msk.bf16.gmra.mrb[16].mxu1 %vm209_vm5, %v192_v53 }
 0x1bf   :  { %v253_v54 = vpop.f32.mrb[8].mxu1 }
 0x1c0   :  { %v374_v55 = vpop.f32.mrb[9].mxu1  ;;  %v275_v56 = vmul.f32 %v253_v54, %v253_v54 }
 0x1c1   :  { %v256_v57 = vpop.f32.mrb[10].mxu1 }
 0x1c2   :  { %v276_v58 = vmul.f32 %v256_v57, %v256_v57  ;;  %v375_v59 = vpop.f32.mrb[11].mxu1  ;;  %v281_v60 = vsel %vm280_vm6, %v275_v56, 0.0 }
 0x1c3   :  { %282 = vadd.xlane.f32.xlu0 %v281_v60 }
 0x1c4   :  { %v284_v61 = vsel %vm280_vm6, %v276_v58, 0.0 }
 0x1c7   :  { %285 = vadd.xlane.f32.xlu0 %v284_v61 }
 0x1c9   :  { %v261_v62 = vpop.f32.mrb[12].mxu1 }
 0x1ca   :  { %v378_v63 = vpop.f32.mrb[13].mxu1  ;;  %v277_v0 = vmul.f32 %v261_v62, %v261_v62 }
 0x1cb   :  { %v264_v1 = vpop.f32.mrb[14].mxu1 }
 0x1cc   :  { %v278_v2 = vmul.f32 %v264_v1, %v264_v1  ;;  %v379_v3 = vpop.f32.mrb[15].mxu1  ;;  %v287_v4 = vsel %vm280_vm6, %v277_v0, 0.0 }
 0x1cd   :  { %288 = vadd.xlane.f32.xlu1 %v287_v4 }
 0x1ce   :  { %v290_v5 = vsel %vm280_vm6, %v278_v2, 0.0 }
 0x1d1   :  { %291 = vadd.xlane.f32.xlu1 %v290_v5  ;;  %v269_v6 = vpop.f32.mrb[16].mxu1 }
 0x1d2   :  { %v279_v7 = vmul.f32 %v269_v6, %v269_v6  ;;  %v382_v8 = vpop.f32.mrb[17].mxu1 }
 0x1d3   :  { %v272_v9 = vpop.f32.mrb[18].mxu1 }
 0x1d4   :  { %v383_v10 = vpop.f32.mrb[19].mxu1  ;;  %v293_v11 = vsel %vm280_vm6, %v279_v7, 0.0 }
 0x1d5   :  { %294 = vadd.xlane.f32.xlu0 %v293_v11 }
 0x250   :  { %v283_v12 = vpop.xlane.xlu0 %282 }
 0x251   :  { %398 = vrsqrt.f32 %v283_v12 }
 0x254   :  { %v286_v13 = vpop.xlane.xlu0 %285 }
 0x255   :  { %400 = vrsqrt.f32 %v286_v13 }
 0x25a   :  { %v289_v14 = vpop.xlane.xlu1 %288 }
 0x25b   :  { %v399_v15 = vpop.eup %398  ;;  %402 = vrsqrt.f32 %v289_v14 }
 0x25c   :  { %v301_v16 = vmul.f32 %v399_v15, %v253_v54 }
 0x25e   :  { %306 = vst.msk [vmem:[%s541_s5] sm:$0xff] %vm280_vm6, %v301_v16  ;;  %v292_v17 = vpop.xlane.xlu1 %291 }
 0x25f   :  { %v401_v18 = vpop.eup %400  ;;  %404 = vrsqrt.f32 %v292_v17 }
 0x260   :  { %v302_v19 = vmul.f32 %v401_v18, %v256_v57 }
 0x262   :  { %307 = vst.msk [vmem:[%s541_s5 + $0x8] sm:$0xff] %vm280_vm6, %v302_v19  ;;  %v295_v20 = vpop.xlane.xlu0 %294 }
 0x263   :  { %406 = vrsqrt.f32 %v295_v20 }
 0x265   :  { %v403_v21 = vpop.eup %402 }
 0x266   :  { %v303_v22 = vmul.f32 %v403_v21, %v261_v62 }
 0x268   :  { %308 = vst.msk [vmem:[%s541_s5 + $0x10] sm:$0xff] %vm280_vm6, %v303_v22 }
 0x269   :  { %v405_v23 = vpop.eup %404 }
 0x26a   :  { %v304_v24 = vmul.f32 %v405_v23, %v264_v1 }
 0x26c   :  { %309 = vst.msk [vmem:[%s541_s5 + $0x18] sm:$0xff] %vm280_vm6, %v304_v24 }
 0x26d   :  { %v407_v25 = vpop.eup %406 }
 0x26e   :  { %v305_v26 = vmul.f32 %v407_v25, %v269_v6 }
 0x270   :  { %310 = vst.msk [vmem:[%s541_s5 + $0x20] sm:$0xff] %vm280_vm6, %v305_v26 }

</bundles_post_ra>
